<compile_context>
chip_gen: v7x
topology: tpu7x:2x2x1
jax: 0.10.0
libtpu: 0.0.40
codegen_flags: <defaults>
</compile_context>

<pallas_src>
import jax
import jax.numpy as jnp
from jax import lax
from jax.experimental import pallas as pl
from jax.experimental.pallas import tpu as pltpu


def _round_up(x: int, m: int) -> int:
    return ((x + m - 1) // m) * m


def _linear_relu_kernel(x_ref, w_ref, o_ref):
    # x_ref: (tb, K)   w_ref: (K, NP)   o_ref: (tb, NP)
    x = x_ref[...]
    w = w_ref[...]
    if x.dtype != w.dtype:
        # Static (trace-time) branch; in-kernel cast adds no HBM traffic.
        x = x.astype(w.dtype)
    acc = lax.dot_general(
        x, w,
        dimension_numbers=(((1,), (0,)), ((), ())),
        preferred_element_type=jnp.float32,
    )
    o_ref[...] = jnp.maximum(acc, 0.0).astype(o_ref.dtype)


def prepare_weight(w, dtype=jnp.float32):
    """One-time weight layout for inference.

    torch-Linear weight (out=10, in=784) -> pad out-features to 128 (lane
    dense), transpose to (K, N) = (784, 128) so the kernel feeds the MXU in
    its native K-major / N-in-lanes orientation. Do this once, not per call.
    """
    out_f, in_f = w.shape
    np_ = _round_up(out_f, 128)
    w_pad = jnp.pad(w, ((0, np_ - out_f), (0, 0)))      # (128, 784)
    return jnp.transpose(w_pad).astype(dtype)            # (784, 128)


def net_forward(x, w_prepared, out_features=10, *,
                batch_tile=1024, out_dtype=jnp.float32):
    """x: (B, 1, 28, 28) or (B, 784); w_prepared: output of prepare_weight."""
    b = x.shape[0]
    k, np_ = w_prepared.shape                 # (784, 128)
    x2d = x.reshape(b, -1)                    # == torch .view(B, -1); no cast
    assert x2d.shape[1] == k, (x2d.shape, k)

    # Batch tile: multiple of 8 sublanes; sized so the grid has >= 2 steps
    # when B allows (v7x has 2 TensorCores), capped at batch_tile so the
    # double-buffered working set stays within scoped VMEM.
    tb = min(batch_tile, max(8, _round_up(pl.cdiv(b, 2), 8)))
    grid = (pl.cdiv(b, tb),)                  # ragged last tile is masked

    x_item = jnp.dtype(x2d.dtype).itemsize
    w_item = jnp.dtype(w_prepared.dtype).itemsize
    o_item = jnp.dtype(out_dtype).itemsize

    # Useful work only (not padded dims).
    cost = pl.CostEstimate(
        flops=2 * b * k * out_features,
        transcendentals=0,
        bytes_accessed=(b * k * x_item + k * np_ * w_item
                        + b * np_ * o_item),
    )

    # Double-buffered activation/weight/output blocks; raise the scoped-VMEM
    # limit only when needed (v5e default is 16 MiB).
    vmem_need = 2 * (tb * k * x_item + k * np_ * w_item + tb * np_ * o_item)
    cp_kwargs = dict(dimension_semantics=("parallel",))
    if vmem_need > (12 << 20):
        cp_kwargs["vmem_limit_bytes"] = min(64 << 20, int(vmem_need * 1.5))

    out = pl.pallas_call(
        _linear_relu_kernel,
        out_shape=jax.ShapeDtypeStruct((b, np_), out_dtype),
        grid_spec=pltpu.PrefetchScalarGridSpec(
            num_scalar_prefetch=0,
            grid=grid,
            in_specs=[
                # Batch-tiled activations: (tb, 784); last dim == full array
                # dim, tb % 8 == 0. No host-side padding of K or B.
                pl.BlockSpec((tb, k), lambda i: (i, 0)),
                # Full (K, 128) weight, constant index -> resident in VMEM.
                pl.BlockSpec((k, np_), lambda i: (0, 0)),
            ],
            # Lane-dense (tb, 128) output block -> unmasked vector stores.
            out_specs=pl.BlockSpec((tb, np_), lambda i: (i, 0)),
        ),
        compiler_params=pltpu.CompilerParams(**cp_kwargs),
        cost_estimate=cost,
    )(x2d, w_prepared)

    # Strip the zero-padded output columns (padded weight rows -> relu(0)=0).
    return out[:, :out_features]


if __name__ == "__main__":
    key = jax.random.PRNGKey(0)
    kx, kw = jax.random.split(key)

    batch = 8
    in_features, out_features = 784, 10

    # Deterministic MNIST-like NCHW input (batch, 1, 28, 28).
    x = jax.random.normal(kx, (batch, 1, 28, 28), dtype=jnp.float32)

    # torch.nn.Linear(784, 10, bias=False) default init:
    # uniform in [-1/sqrt(in), 1/sqrt(in)], weight shape (out, in).
    bound = 1.0 / (in_features ** 0.5)
    w = jax.random.uniform(
        kw, (out_features, in_features), dtype=jnp.float32,
        minval=-bound, maxval=bound)

    # One-time weight layout (static for inference). Use dtype=jnp.bfloat16
    # on v5e/v6e/v7x if activations already arrive as bf16.
    w_prepared = prepare_weight(w, dtype=jnp.float32)

    y = net_forward(x, w_prepared, out_features)
    jax.block_until_ready(y)

    # Sanity check against plain-JAX reference (bias=False).
    ref = jnp.maximum(x.reshape(batch, -1) @ w.T, 0.0)
    assert y.shape == (batch, out_features)
    assert jnp.allclose(y, ref, atol=1e-4, rtol=1e-4), (
        float(jnp.max(jnp.abs(y - ref))))

    print("KERNEL_OK")
</pallas_src>

<mosaic_0001>
module attributes {stable_mosaic.version = 11 : i64} {
  func.func @_linear_relu_kernel(%arg0: i32, %arg1: memref<8x784xf32, #tpu.memory_space<vmem>>, %arg2: memref<784x128xf32, #tpu.memory_space<vmem>>, %arg3: memref<8x128xf32, #tpu.memory_space<vmem>>) attributes {dimension_semantics = [#tpu.dimension_semantics<parallel>], iteration_bounds = array<i64: 1>, scalar_prefetch = 0 : i64, scratch_operands = 0 : i64, tpu.core_type = #tpu.core_type<tc>, window_params = [{transform_indices = @transform_0, window_bounds = array<i64: 8, 784>}, {pipeline_mode = #tpu.pipeline_mode<synchronous>, transform_indices = @transform_1, window_bounds = array<i64: 784, 128>}, {transform_indices = @transform_2, window_bounds = array<i64: 8, 128>}]} {
    %c0 = arith.constant 0 : index
    %c0_0 = arith.constant 0 : index
    %0 = vector.load %arg1[%c0, %c0_0] : memref<8x784xf32, #tpu.memory_space<vmem>>, vector<8x784xf32>
    %c0_1 = arith.constant 0 : index
    %c0_2 = arith.constant 0 : index
    %1 = vector.load %arg2[%c0_1, %c0_2] : memref<784x128xf32, #tpu.memory_space<vmem>>, vector<784x128xf32>
    %cst = arith.constant dense<0.000000e+00> : vector<8x128xf32>
    %2 = tpu.matmul %0, %1, %cst {dimension_numbers = #tpu.dot_dimension_numbers<[1], [0], [0], [1], [0, 0, 1, 1], [], []>} : vector<8x784xf32>, vector<784x128xf32>, vector<8x128xf32> -> vector<8x128xf32>
    %cst_3 = arith.constant 0.000000e+00 : f32
    %3 = vector.broadcast %cst_3 : f32 to vector<8x128xf32>
    %4 = arith.maximumf %2, %3 : vector<8x128xf32>
    %c0_4 = arith.constant 0 : index
    %c0_5 = arith.constant 0 : index
    %5 = vector.load %arg3[%c0_4, %c0_5] : memref<8x128xf32, #tpu.memory_space<vmem>>, vector<8x128xf32>
    tpu.vector_store %arg3[%c0_4, %c0_5], %4 {strides = array<i32>} : memref<8x128xf32, #tpu.memory_space<vmem>>, vector<8x128xf32>,
    return
  }
  func.func @transform_0(%arg0: i32) -> (i32, i32) {
    %c0_i32 = arith.constant 0 : i32
    %c0_i32_0 = arith.constant 0 : i32
    return %arg0, %c0_i32 : i32, i32
  }
  func.func @transform_1(%arg0: i32) -> (i32, i32) {
    %c0_i32 = arith.constant 0 : i32
    %c0_i32_0 = arith.constant 0 : i32
    %c0_i32_1 = arith.constant 0 : i32
    return %c0_i32, %c0_i32_0 : i32, i32
  }
  func.func @transform_2(%arg0: i32) -> (i32, i32) {
    %c0_i32 = arith.constant 0 : i32
    %c0_i32_0 = arith.constant 0 : i32
    return %arg0, %c0_i32 : i32, i32
  }
}

</mosaic_0001>

<bundles_post_ra>
// kernel: tpu_custom_call.1
= control target key start
LH: loop header
LB: loop body
LE: loop exit
PB: predicated region body
PF: predicated region fallthrough
CT: control target
= control target key end

     0   :  { %7 = vsyncpa [#allocation3], 0  ;;  %s806_s0 = inlined_call_operand.hbm [shape: f32[8,784], index: 0, kind: input, shape index: {}]   ;;  %s807_s1 = inlined_call_operand.hbm [shape: f32[784,128], index: 1, kind: input, shape index: {}]   ;;  %s808_s2 = inlined_call_operand.hbm [shape: f32[8,128], index: 2, kind: output, shape index: {}]  }
   0x1   :  { %8 = vsyncpa [#allocation6], 0 }
   0x2   :  { %9 = vsyncpa [#allocation4], 0  ;;  %s740_s9 = smov [#allocation2]   ;;  %s741_s11 = smov [#allocation5]  }
   0x3   :  { %s16_s10 = sshll.u32 %s740_s9, 4  ;;  %s25_s12 = sshll.u32 %s741_s11, 4  ;;  %s17_s10 = int_to_ptr.vmem [resolvable:$true] %s16_s10  ;;  %s763_s12 = int_to_ptr.vmem [resolvable:$true] %s25_s12 }
   0x4   :  { %s668_s15 = scalar_lea.hbm %s806_s0, 896 }
   0x5   :  { %p669_p0 = scmp.ne.s32.totalorder %s806_s0, %s668_s15  ;;  %p672_p1 = scmp.lt.u32.totalorder %s668_s15, %s806_s0 }
   0x7   :  { %p674_p2 = pnand %p672_p1, %p669_p0 }
   0x9   :  { %677 = shalt.err (!%p674_p2)
}
   0xa   :  { %s678_s20 = scalar_lea.vmem %s17_s10, 896  ;;  %p683_p4 = scmp.lt.s32.totalorder %s17_s10, %s17_s10 }
   0xb   :  { %p679_p3 = scmp.ne.s32.totalorder %s17_s10, %s678_s20  ;;  %p684_p5 = scmp.lt.s32.totalorder %s678_s20, %s678_s20 }
   0xd   :  { %p685_p6 = por %p684_p5, %p683_p4 }
   0xf   :  { %p686_p7 = pnand %p685_p6, %p679_p3 }
  0x11   :  { %689 = shalt.err (!%p686_p7)
}
  0x12   :  { %19 = dma.hbm_to_vmem [thread:$0]  %s806_s0, 896, %s17_s10, [#allocation3]  }
  0x13   :  { %s690_s25 = scalar_lea.hbm %s807_s1, 12544 }
  0x14   :  { %p691_p8 = scmp.ne.s32.totalorder %s807_s1, %s690_s25  ;;  %p694_p9 = scmp.lt.u32.totalorder %s690_s25, %s807_s1 }
  0x16   :  { %p696_p10 = pnand %p694_p9, %p691_p8 }
  0x18   :  { %699 = shalt.err (!%p696_p10)
}
  0x19   :  { %s700_s30 = scalar_lea.vmem %s763_s12, 12544  ;;  %p705_p12 = scmp.lt.s32.totalorder %s763_s12, %s763_s12 }
  0x1a   :  { %p701_p11 = scmp.ne.s32.totalorder %s763_s12, %s700_s30  ;;  %p706_p13 = scmp.lt.s32.totalorder %s700_s30, %s700_s30 }
  0x1c   :  { %p707_p0 = por %p706_p13, %p705_p12 }
  0x1e   :  { %p708_p1 = pnand %p707_p0, %p701_p11 }
  0x20   :  { %711 = shalt.err (!%p708_p1)
}
  0x21   :  { %s742_s0 = smov 128   ;;  %s743_s3 = smov 8  }
  0x22   :  { %31 = dma.hbm_to_vmem [thread:$0]  %s807_s1, 12544, %s763_s12, [#allocation6], %s742_s0, %s742_s0, %s743_s3  }
  0x23   :  { %734 = dma.done.wait [#allocation3], 896  }
  0x24   :  { %735 = vsyncadd [#allocation3], 4294966400 }
  0x25   :  { %736 = dma.done.wait [#allocation6], 12544  }
  0x26   :  { %737 = vsyncadd [#allocation6], 4294954752  ;;  %v61_v0 = vld [vmem:[#allocation5 + $0x80] sm:$0xff]  ;;  %v62_v1 = vld [vmem:[#allocation5 + $0x88] sm:$0xff]  ;;  %vm745_vm0 = vmmov 0   ;;  %vm143_vm1 = vcmask 130048  }
  0x27   :  { %v93_v2 = vld [vmem:[#allocation5 + $0x180] sm:$0xff]  ;;  %v561_v3 = vpack.c.bf16 %v62_v1, %v61_v0  ;;  %v94_v4 = vld [vmem:[#allocation5 + $0x188] sm:$0xff]  ;;  %v63_v11 = vld [vmem:[#allocation5 + $0x90] sm:$0xff]  ;;  %s747_s1 = smov [#allocation7]  }
  0x28   :  { %v45_v5 = vld [vmem:[#allocation5] sm:$0xff]  ;;  %v46_v6 = vld [vmem:[#allocation5 + $0x8] sm:$0xff]  ;;  %v593_v7 = vpack.c.bf16 %v94_v4, %v93_v2  ;;  %v64_v13 = vld [vmem:[#allocation5 + $0x98] sm:$0xff]  ;;  %s435_s6 = sshll.u32 %s747_s1, 4  ;;  %s436_s6 = int_to_ptr.vmem [resolvable:$true] %s435_s6 }
  0x29   :  { %v563_v8 = vpack.c.bf16 %v46_v6, %v45_v5  ;;  %v77_v9 = vld [vmem:[#allocation5 + $0x100] sm:$0xff]  ;;  %v78_v10 = vld [vmem:[#allocation5 + $0x108] sm:$0xff]  ;;  %562 = vmatprep.subr.bf16.mxu0 %v561_v3  ;;  %v95_v14 = vld [vmem:[#allocation5 + $0x190] sm:$0xff]  ;;  %v565_v16 = vpack.c.bf16 %v64_v13, %v63_v11  ;;  %s712_s7 = scalar_lea.vmem %s436_s6, 128  ;;  %p717_p3 = scmp.lt.s32.totalorder %s436_s6, %s436_s6 }
  0x2a   :  { %v595_v12 = vpack.c.bf16 %v78_v10, %v77_v9  ;;  %v96_v15 = vld [vmem:[#allocation5 + $0x198] sm:$0xff]  ;;  %594 = vmatprep.subr.bf16.mxu1 %v593_v7  ;;  %v47_v18 = vld [vmem:[#allocation5 + $0x10] sm:$0xff]  ;;  %v65_v23 = vld [vmem:[#allocation5 + $0xa0] sm:$0xff]  ;;  %p713_p2 = scmp.ne.s32.totalorder %s436_s6, %s712_s7  ;;  %p718_p4 = scmp.lt.s32.totalorder %s712_s7, %s712_s7 }
  0x2b   :  { %564 = vmatpush3.bf16.msra.mxu0 %v563_v8  ;;  %v597_v17 = vpack.c.bf16 %v96_v15, %v95_v14  ;;  %v48_v19 = vld [vmem:[#allocation5 + $0x18] sm:$0xff]  ;;  %v79_v20 = vld [vmem:[#allocation5 + $0x110] sm:$0xff]  ;;  %v66_v24 = vld [vmem:[#allocation5 + $0xa8] sm:$0xff] }
  0x2c   :  { %596 = vmatpush3.bf16.msra.mxu1 %v595_v12  ;;  %v567_v21 = vpack.c.bf16 %v48_v19, %v47_v18  ;;  %v80_v22 = vld [vmem:[#allocation5 + $0x118] sm:$0xff]  ;;  %566 = vmatprep.subr.bf16.mxu0 %v565_v16  ;;  %v569_v26 = vpack.c.bf16 %v66_v24, %v65_v23  ;;  %v97_v27 = vld [vmem:[#allocation5 + $0x1a0] sm:$0xff]  ;;  %v98_v28 = vld [vmem:[#allocation5 + $0x1a8] sm:$0xff]  ;;  %p719_p5 = por %p718_p4, %p717_p3 }
  0x2d   :  { %598 = vmatprep.subr.bf16.mxu1 %v597_v17  ;;  %v599_v25 = vpack.c.bf16 %v80_v22, %v79_v20  ;;  %v49_v29 = vld [vmem:[#allocation5 + $0x20] sm:$0xff]  ;;  %v601_v30 = vpack.c.bf16 %v98_v28, %v97_v27  ;;  %v50_v31 = vld [vmem:[#allocation5 + $0x28] sm:$0xff]  ;;  %v67_v35 = vld [vmem:[#allocation5 + $0xb0] sm:$0xff] }
  0x2e   :  { %v81_v32 = vld [vmem:[#allocation5 + $0x120] sm:$0xff]  ;;  %v82_v33 = vld [vmem:[#allocation5 + $0x128] sm:$0xff]  ;;  %v571_v34 = vpack.c.bf16 %v50_v31, %v49_v29  ;;  %v68_v36 = vld [vmem:[#allocation5 + $0xb8] sm:$0xff]  ;;  %p720_p6 = pnand %p719_p5, %p713_p2 }
  0x2f   :  { %568 = vmatpush3.bf16.msra.mxu0 %v567_v21  ;;  %v99_v37 = vld [vmem:[#allocation5 + $0x1b0] sm:$0xff]  ;;  %v603_v38 = vpack.c.bf16 %v82_v33, %v81_v32  ;;  %v573_v39 = vpack.c.bf16 %v68_v36, %v67_v35  ;;  %v100_v40 = vld [vmem:[#allocation5 + $0x1b8] sm:$0xff]  ;;  %v69_v46 = vld [vmem:[#allocation5 + $0xc0] sm:$0xff] }
  0x30   :  { %600 = vmatpush3.bf16.msra.mxu1 %v599_v25  ;;  %570 = vmatprep.subr.bf16.mxu0 %v569_v26  ;;  %v51_v41 = vld [vmem:[#allocation5 + $0x30] sm:$0xff]  ;;  %v52_v42 = vld [vmem:[#allocation5 + $0x38] sm:$0xff]  ;;  %v605_v43 = vpack.c.bf16 %v100_v40, %v99_v37  ;;  %v70_v47 = vld [vmem:[#allocation5 + $0xc8] sm:$0xff] }
  0x31   :  { %602 = vmatprep.subr.bf16.mxu1 %v601_v30  ;;  %v83_v44 = vld [vmem:[#allocation5 + $0x130] sm:$0xff]  ;;  %v84_v45 = vld [vmem:[#allocation5 + $0x138] sm:$0xff]  ;;  %v101_v48 = vld [vmem:[#allocation5 + $0x1c0] sm:$0xff]  ;;  %v575_v50 = vpack.c.bf16 %v52_v42, %v51_v41  ;;  %v577_v52 = vpack.c.bf16 %v70_v47, %v69_v46 }
  0x32   :  { %v102_v49 = vld [vmem:[#allocation5 + $0x1c8] sm:$0xff]  ;;  %v607_v51 = vpack.c.bf16 %v84_v45, %v83_v44  ;;  %v53_v53 = vld [vmem:[#allocation5 + $0x40] sm:$0xff]  ;;  %v71_v58 = vld [vmem:[#allocation5 + $0xd0] sm:$0xff] }
  0x33   :  { %572 = vmatpush3.bf16.msra.mxu0 %v571_v34  ;;  %v54_v54 = vld [vmem:[#allocation5 + $0x48] sm:$0xff]  ;;  %v85_v55 = vld [vmem:[#allocation5 + $0x140] sm:$0xff]  ;;  %v609_v56 = vpack.c.bf16 %v102_v49, %v101_v48  ;;  %v72_v59 = vld [vmem:[#allocation5 + $0xd8] sm:$0xff] }
  0x34   :  { %604 = vmatpush3.bf16.msra.mxu1 %v603_v38  ;;  %574 = vmatprep.subr.bf16.mxu0 %v573_v39  ;;  %v86_v57 = vld [vmem:[#allocation5 + $0x148] sm:$0xff]  ;;  %v103_v60 = vld [vmem:[#allocation5 + $0x1d0] sm:$0xff]  ;;  %v104_v61 = vld [vmem:[#allocation5 + $0x1d8] sm:$0xff]  ;;  %v579_v62 = vpack.c.bf16 %v54_v54, %v53_v53  ;;  %v581_v0 = vpack.c.bf16 %v72_v59, %v71_v58 }
  0x35   :  { %606 = vmatprep.subr.bf16.mxu1 %v605_v43  ;;  %v611_v63 = vpack.c.bf16 %v86_v57, %v85_v55  ;;  %v55_v1 = vld [vmem:[#allocation5 + $0x50] sm:$0xff]  ;;  %v56_v2 = vld [vmem:[#allocation5 + $0x58] sm:$0xff]  ;;  %v613_v4 = vpack.c.bf16 %v104_v61, %v103_v60  ;;  %v73_v6 = vld [vmem:[#allocation5 + $0xe0] sm:$0xff]  ;;  %v746_v60 = vmov 0.0  }
  0x36   :  { %v87_v3 = vld [vmem:[#allocation5 + $0x150] sm:$0xff]  ;;  %v88_v5 = vld [vmem:[#allocation5 + $0x158] sm:$0xff]  ;;  %v74_v7 = vld [vmem:[#allocation5 + $0xe8] sm:$0xff]  ;;  %v583_v10 = vpack.c.bf16 %v56_v2, %v55_v1 }
  0x37   :  { %576 = vmatpush3.bf16.msra.mxu0 %v575_v50  ;;  %v105_v8 = vld [vmem:[#allocation5 + $0x1e0] sm:$0xff]  ;;  %v106_v9 = vld [vmem:[#allocation5 + $0x1e8] sm:$0xff]  ;;  %v615_v13 = vpack.c.bf16 %v88_v5, %v87_v3  ;;  %v585_v14 = vpack.c.bf16 %v74_v7, %v73_v6  ;;  %v39_v16 = vld [vmem:[#allocation2 + $0x8] sm:$0xff]  ;;  %v744_v50 = vmov 0.0|0.0  }
  0x38   :  { %608 = vmatpush3.bf16.msra.mxu1 %v607_v51  ;;  %578 = vmatprep.subr.bf16.mxu0 %v577_v52  ;;  %v57_v11 = vld [vmem:[#allocation5 + $0x60] sm:$0xff]  ;;  %v58_v12 = vld [vmem:[#allocation5 + $0x68] sm:$0xff]  ;;  %v617_v18 = vpack.c.bf16 %v106_v9, %v105_v8  ;;  %v75_v20 = vld [vmem:[#allocation5 + $0xf0] sm:$0xff] }
  0x39   :  { %610 = vmatprep.subr.bf16.mxu1 %v609_v56  ;;  %v89_v15 = vld [vmem:[#allocation5 + $0x160] sm:$0xff]  ;;  %v90_v19 = vld [vmem:[#allocation5 + $0x168] sm:$0xff]  ;;  %v76_v21 = vld [vmem:[#allocation5 + $0xf8] sm:$0xff]  ;;  %211 = vmatprep.mubr.f32.mxu0 %v39_v16  ;;  %v587_v24 = vpack.c.bf16 %v58_v12, %v57_v11 }
  0x3a   :  { %v41_v17 = vld [vmem:[#allocation2 + $0x18] sm:$0xff]  ;;  %v107_v22 = vld [vmem:[#allocation5 + $0x1f0] sm:$0xff]  ;;  %v108_v23 = vld [vmem:[#allocation5 + $0x1f8] sm:$0xff]  ;;  %v619_v25 = vpack.c.bf16 %v90_v19, %v89_v15  ;;  %v589_v26 = vpack.c.bf16 %v76_v21, %v75_v20 }
  0x3b   :  { %580 = vmatpush3.bf16.msra.mxu0 %v579_v62  ;;  %281 = vmatprep.mubr.f32.mxu1 %v41_v17  ;;  %v59_v27 = vld [vmem:[#allocation5 + $0x70] sm:$0xff]  ;;  %v60_v28 = vld [vmem:[#allocation5 + $0x78] sm:$0xff]  ;;  %v621_v30 = vpack.c.bf16 %v108_v23, %v107_v22  ;;  %v125_v32 = vld [vmem:[#allocation5 + $0x280] sm:$0xff] }
  0x3c   :  { %612 = vmatpush3.bf16.msra.mxu1 %v611_v63  ;;  %582 = vmatprep.subr.bf16.mxu0 %v581_v0  ;;  %v91_v29 = vld [vmem:[#allocation5 + $0x170] sm:$0xff]  ;;  %v92_v31 = vld [vmem:[#allocation5 + $0x178] sm:$0xff]  ;;  %v126_v33 = vld [vmem:[#allocation5 + $0x288] sm:$0xff]  ;;  %v591_v34 = vpack.c.bf16 %v60_v28, %v59_v27 }
  0x3d   :  { %614 = vmatprep.subr.bf16.mxu1 %v613_v4  ;;  %v623_v35 = vpack.c.bf16 %v92_v31, %v91_v29  ;;  %v625_v36 = vpack.c.bf16 %v126_v33, %v125_v32  ;;  %v109_v37 = vld [vmem:[#allocation5 + $0x200] sm:$0xff]  ;;  %v110_v38 = vld [vmem:[#allocation5 + $0x208] sm:$0xff]  ;;  %v127_v39 = vld [vmem:[#allocation5 + $0x290] sm:$0xff] }
  0x3e   :  { %v128_v40 = vld [vmem:[#allocation5 + $0x298] sm:$0xff]  ;;  %v38_v41 = vld [vmem:[#allocation2] sm:$0xff]  ;;  %v627_v43 = vpack.c.bf16 %v110_v38, %v109_v37  ;;  %v111_v44 = vld [vmem:[#allocation5 + $0x210] sm:$0xff] }
  0x3f   :  { %584 = vmatpush3.bf16.msra.mxu0 %v583_v10  ;;  %v40_v42 = vld [vmem:[#allocation2 + $0x10] sm:$0xff]  ;;  %v629_v45 = vpack.c.bf16 %v128_v40, %v127_v39  ;;  %v129_v47 = vld [vmem:[#allocation5 + $0x2a0] sm:$0xff]  ;;  %v130_v48 = vld [vmem:[#allocation5 + $0x2a8] sm:$0xff] }
  0x40   :  { %616 = vmatpush3.bf16.msra.mxu1 %v615_v13  ;;  %586 = vmatprep.subr.bf16.mxu0 %v585_v14  ;;  %v112_v46 = vld [vmem:[#allocation5 + $0x218] sm:$0xff]  ;;  %v43_v49 = vld [vmem:[#allocation2 + $0x28] sm:$0xff]  ;;  %v141_v51 = vld [vmem:[#allocation5 + $0x300] sm:$0xff]  ;;  %v633_v55 = vpack.c.bf16 %v130_v48, %v129_v47 }
  0x41   :  { %618 = vmatprep.subr.bf16.mxu1 %v617_v18  ;;  %v142_v52 = vld [vmem:[#allocation5 + $0x308] sm:$0xff]  ;;  %v631_v54 = vpack.c.bf16 %v112_v46, %v111_v44  ;;  %v113_v56 = vld [vmem:[#allocation5 + $0x220] sm:$0xff]  ;;  %v131_v58 = vld [vmem:[#allocation5 + $0x2b0] sm:$0xff] }
  0x42   :  { %v658_v53 = vpack.c.bf16 %v142_v52, %v141_v51  ;;  %v114_v57 = vld [vmem:[#allocation5 + $0x228] sm:$0xff]  ;;  %v132_v59 = vld [vmem:[#allocation5 + $0x2b8] sm:$0xff]  ;;  %v115_v0 = vld [vmem:[#allocation5 + $0x230] sm:$0xff] }
  0x43   :  { %588 = vmatpush3.bf16.msra.mxu0 %v587_v24  ;;  %v44_v61 = vld [vmem:[#allocation2 + $0x30] sm:$0xff]  ;;  %v635_v62 = vpack.c.bf16 %v114_v57, %v113_v56  ;;  %v637_v63 = vpack.c.bf16 %v132_v59, %v131_v58  ;;  %v133_v2 = vld [vmem:[#allocation5 + $0x2c0] sm:$0xff]  ;;  %v134_v3 = vld [vmem:[#allocation5 + $0x2c8] sm:$0xff] }
  0x44   :  { %620 = vmatpush3.bf16.msra.mxu1 %v619_v25  ;;  %590 = vmatprep.subr.bf16.mxu0 %v589_v26  ;;  %v116_v1 = vld [vmem:[#allocation5 + $0x238] sm:$0xff]  ;;  %v641_v5 = vpack.c.bf16 %v134_v3, %v133_v2  ;;  %v117_v6 = vld [vmem:[#allocation5 + $0x240] sm:$0xff]  ;;  %v118_v7 = vld [vmem:[#allocation5 + $0x248] sm:$0xff] }
  0x45   :  { %622 = vmatprep.subr.bf16.mxu1 %v621_v30  ;;  %v639_v4 = vpack.c.bf16 %v116_v1, %v115_v0  ;;  %v135_v8 = vld [vmem:[#allocation5 + $0x2d0] sm:$0xff]  ;;  %v136_v9 = vld [vmem:[#allocation5 + $0x2d8] sm:$0xff]  ;;  %v643_v10 = vpack.c.bf16 %v118_v7, %v117_v6  ;;  %v137_v14 = vld [vmem:[#allocation5 + $0x2e0] sm:$0xff] }
  0x46   :  { %v645_v11 = vpack.c.bf16 %v136_v9, %v135_v8  ;;  %v119_v12 = vld [vmem:[#allocation5 + $0x250] sm:$0xff]  ;;  %v120_v13 = vld [vmem:[#allocation5 + $0x258] sm:$0xff]  ;;  %v138_v15 = vld [vmem:[#allocation5 + $0x2e8] sm:$0xff] }
  0x47   :  { %592 = vmatpush3.bf16.msra.mxu0 %v591_v34  ;;  %v647_v16 = vpack.c.bf16 %v120_v13, %v119_v12  ;;  %v649_v17 = vpack.c.bf16 %v138_v15, %v137_v14  ;;  %v121_v18 = vld [vmem:[#allocation5 + $0x260] sm:$0xff]  ;;  %v122_v19 = vld [vmem:[#allocation5 + $0x268] sm:$0xff]  ;;  %v139_v20 = vld [vmem:[#allocation5 + $0x2f0] sm:$0xff] }
  0x48   :  { %624 = vmatpush3.bf16.msra.mxu1 %v623_v35  ;;  %626 = vmatprep.subr.bf16.mxu0 %v625_v36  ;;  %v140_v21 = vld [vmem:[#allocation5 + $0x2f8] sm:$0xff]  ;;  %v651_v22 = vpack.c.bf16 %v122_v19, %v121_v18  ;;  %v123_v24 = vld [vmem:[#allocation5 + $0x270] sm:$0xff]  ;;  %v42_v27 = vld [vmem:[#allocation2 + $0x20] sm:$0xff] }
  0x49   :  { %657 = vmatprep.subr.bf16.mxu1 %v744_v50  ;;  %v653_v23 = vpack.c.bf16 %v140_v21, %v139_v20  ;;  %v124_v25 = vld [vmem:[#allocation5 + $0x278] sm:$0xff] }
  0x4a   :  { %212 = vmatmul.mubr.f32.vlgmr.msra.gmra.mrb[0].mxu0 %v38_v41  ;;  %v655_v26 = vpack.c.bf16 %v124_v25, %v123_v24 }
  0x4b   :  { %282 = vmatmul.mubr.f32.vlgmr.msra.gmra.mrb[0].mxu1 %v40_v42  ;;  %628 = vmatpush3.bf16.msra.mxu0 %v627_v43 }
  0x4c   :  { %630 = vmatprep.subr.bf16.mxu0 %v629_v45  ;;  %351 = vmatprep.mubr.f32.mxu0 %v43_v49 }
  0x4d   :  { %659 = vmatpush3.bf16.msra.mxu1 %v658_v53  ;;  %558 = vmatprep.mubr.msk.f32.mxu1 %vm745_vm0, %v746_v60 }
  0x4f   :  { %632 = vmatpush3.bf16.msra.mxu0 %v631_v54 }
  0x50   :  { %634 = vmatprep.subr.bf16.mxu0 %v633_v55  ;;  %559 = vmatmul.mubr.msk.f32.vlgmr.msra.gmra.mrb[2].mxu1 %vm143_vm1, %v44_v61 }
  0x53   :  { %636 = vmatpush3.bf16.msra.mxu0 %v635_v62 }
  0x54   :  { %638 = vmatprep.subr.bf16.mxu0 %v637_v63 }
  0x57   :  { %640 = vmatpush3.bf16.msra.mxu0 %v639_v4 }
  0x58   :  { %642 = vmatprep.subr.bf16.mxu0 %v641_v5 }
  0x5b   :  { %644 = vmatpush3.bf16.msra.mxu0 %v643_v10 }
  0x5c   :  { %646 = vmatprep.subr.bf16.mxu0 %v645_v11 }
  0x5f   :  { %648 = vmatpush3.bf16.msra.mxu0 %v647_v16 }
  0x60   :  { %650 = vmatprep.subr.bf16.mxu0 %v649_v17 }
  0x63   :  { %652 = vmatpush3.bf16.msra.mxu0 %v651_v22 }
  0x64   :  { %654 = vmatprep.subr.bf16.mxu0 %v653_v23 }
  0x67   :  { %656 = vmatpush3.bf16.msra.mxu0 %v655_v26 }
  0x6a   :  { %352 = vmatmul.mubr.f32.vlgmr.msra.gmra.mrb[2].mxu0 %v42_v27 }
 0x11d   :  { %v478_v28 = vpop.f32.mrb[0].mxu0 }
 0x11e   :  { %v513_v29 = vpop.f32.mrb[0].mxu1  ;;  %v479_v30 = vpop.f32.mrb[1].mxu0 }
 0x11f   :  { %v480_v31 = vadd.f32 %v479_v30, %v478_v28  ;;  %v514_v32 = vpop.f32.mrb[1].mxu1 }
 0x120   :  { %v515_v33 = vadd.f32 %v514_v32, %v513_v29 }
 0x122   :  { %v284_v34 = vadd.f32 %v515_v33, %v480_v31 }
 0x123   :  { %v423_v35 = vpop.f32.mrb[2].mxu1 }
 0x124   :  { %v560_v36 = vpop.f32.mrb[3].mxu1 }
 0x13d   :  { %v548_v37 = vpop.f32.mrb[2].mxu0 }
 0x13e   :  { %v549_v38 = vpop.f32.mrb[3].mxu0 }
 0x13f   :  { %v550_v39 = vadd.f32 %v549_v38, %v548_v37 }
 0x141   :  { %v354_v40 = vadd.f32 %v550_v39, %v284_v34 }
 0x143   :  { %v424_v41 = vadd.f32 %v423_v35, %v354_v40 }
 0x145   :  { %v427_v42 = vmax.f32 %v424_v41, 0.0 }
 0x147   :  { %428 = vst [vmem:[#allocation7] sm:$0xff] %v427_v42 }
 0x148   :  { %723 = shalt.err (!%p720_p6)
}
 0x149   :  { %s724_s10 = scalar_lea.hbm %s808_s2, 128 }
 0x14a   :  { %p725_p7 = scmp.ne.s32.totalorder %s808_s2, %s724_s10  ;;  %p728_p8 = scmp.lt.u32.totalorder %s724_s10, %s808_s2 }
 0x14c   :  { %p730_p9 = pnand %p728_p8, %p725_p7 }
 0x14e   :  { %733 = shalt.err (!%p730_p9)
}
 0x14f   :  { %438 = dma.vmem_to_hbm [thread:$0]  %s436_s6, 128, %s808_s2, [#allocation4]  }
 0x150   :  { %738 = dma.done.wait [#allocation4], 128  }
 0x151   :  { %739 = vsyncadd [#allocation4], 4294967168 }
 0x152   :  { %442 = vsyncpa [#allocation3], 1 }
 0x153   :  { %443 = vsyncpa [#allocation6], 1 }
 0x154   :  { %444 = vsyncpa [#allocation4], 1 }

</bundles_post_ra>
